<compile_context>
chip_gen: v6e
topology: v6e:2x2x1
jax: 0.10.0
libtpu: 0.0.40
codegen_flags: <defaults>
</compile_context>

<pallas_src>
import jax
import jax.numpy as jnp
from jax.experimental import pallas as pl
from jax.experimental.pallas import tpu as pltpu


def _round_up(x, m):
    return ((x + m - 1) // m) * m


def _leaky_relu(v):
    return jnp.where(v >= 0, v, 0.01 * v)


def odrnn_kernel(xt_ref, w_ref, wt_ref, wout_ref, o_ref):
    """One batch tile.

    xt_ref   : [D, TB]   bf16  feature-major activations (batch on the lane axis)
    w_ref    : [L, H, H] f32   coupling-layer weights, PyTorch [out, in] orientation
    wt_ref   : [L, H, H] f32   transposed coupling-layer weights
    wout_ref : [D, 1]    f32   output-layer weight as a column
    o_ref    : [1, TB]   f32   sigmoid outputs for this tile (lane-dense store)
    """
    num_layers, h, _ = w_ref.shape

    xt = xt_ref[...].astype(jnp.float32)          # [D, TB], f32 math from here on
    x1t = xt[:h, :]                               # [H, TB]
    x2t = xt[h:, :]                               # [H, TB]

    # Additive-coupling layers, transposed identities:
    #   x_1 + LReLU(-(x_2 @ W.T))  ->  x1t + LReLU(-(W   @ x2t))
    #   x_2 + LReLU(  x_1 @ W   )  ->  x2t + LReLU(  W.T @ x1t)
    for l in range(num_layers):                   # static, unrolled (L = 4)
        x1t = x1t + _leaky_relu(
            -jnp.dot(w_ref[l], x2t, preferred_element_type=jnp.float32))
        x2t = x2t + _leaky_relu(
            jnp.dot(wt_ref[l], x1t, preferred_element_type=jnp.float32))

    cat_t = jnp.concatenate([x1t, x2t], axis=0)   # [D, TB]  (torch.cat dim=1, transposed)

    # logits^T = sum_d W_out[d] * cat^T[d, :]  -> lane-dense [1, TB] row
    logits = jnp.sum(cat_t * wout_ref[...], axis=0, keepdims=True)

    # sigmoid: exp on the EUP, approximate reciprocal also on the EUP (no VALU divide)
    denom = 1.0 + jnp.exp(-logits)
    o_ref[...] = pl.reciprocal(denom, approx=True).astype(o_ref.dtype)


def odrnn_forward(x, w_stack, w_out, *, batch_block=1024):
    """x: [B, D]; w_stack: [4, H, H] (PyTorch [out, in]); w_out: [1, D]. Returns [B, 1]."""
    B, D = x.shape
    L, H, H2 = w_stack.shape
    assert H == H2 and D == 2 * H and w_out.shape == (1, D)

    # Batch tile: multiple of 128 so loads and the output row are lane-dense.
    # Tiles here are tiny (tens of KiB), so the same choice fits v5e/v6e (128 MiB VMEM)
    # and v7x (64 MiB); sweep batch_block on the target generation.
    tb = _round_up(min(batch_block, _round_up(B, 128)), 128)
    b_pad = _round_up(B, tb)
    num_tiles = b_pad // tb

    # Layout plumbing outside the kernel: bf16 activations, pad batch to the tile grid,
    # and go feature-major so batch rides the 128-lane axis inside the kernel.
    x_bf16 = x.astype(jnp.bfloat16)
    if b_pad != B:
        x_bf16 = jnp.pad(x_bf16, ((0, b_pad - B), (0, 0)))
    xt = x_bf16.T                                           # [D, b_pad]

    w_stack = w_stack.astype(jnp.float32)
    wt_stack = jnp.transpose(w_stack, (0, 2, 1))            # VMEM-resident; negligible bytes
    w_out_col = w_out.astype(jnp.float32).reshape(D, 1)

    flops = 2 * b_pad * (L * 2 * H * H + D)                 # 8 HxH matmuls + output dot / row
    bytes_accessed = int(xt.size * 2 + b_pad * 4
                         + (w_stack.size + wt_stack.size + w_out_col.size) * 4)

    out_row = pl.pallas_call(
        odrnn_kernel,
        out_shape=jax.ShapeDtypeStruct((1, b_pad), jnp.float32),
        grid=(num_tiles,),
        in_specs=[
            pl.BlockSpec((D, tb), lambda i: (0, i)),        # streamed / double-buffered x
            pl.BlockSpec((L, H, H), lambda i: (0, 0, 0)),   # weights: resident across steps
            pl.BlockSpec((L, H, H), lambda i: (0, 0, 0)),
            pl.BlockSpec((D, 1), lambda i: (0, 0)),
        ],
        out_specs=pl.BlockSpec((1, tb), lambda i: (0, i)),  # lane-dense output row
        compiler_params=pltpu.CompilerParams(
            dimension_semantics=("parallel",)),             # shard batch across TCs on v7x
        cost_estimate=pl.CostEstimate(
            flops=flops, transcendentals=b_pad, bytes_accessed=bytes_accessed),
    )(xt, w_stack, wt_stack, w_out_col)

    return out_row[0, :B].reshape(B, 1)


def init_params(key, input_size, num_layers=4):
    """PyTorch nn.Linear default init (uniform +/- 1/sqrt(fan_in)); biases unused in forward."""
    h = input_size // 2
    k_layers, k_out = jax.random.split(key)
    bound = 1.0 / jnp.sqrt(h)
    w_stack = jax.random.uniform(k_layers, (num_layers, h, h), jnp.float32, -bound, bound)
    bound_out = 1.0 / jnp.sqrt(input_size)
    w_out = jax.random.uniform(k_out, (1, input_size), jnp.float32, -bound_out, bound_out)
    return w_stack, w_out


def odrnn_forward_ref(x, w_stack, w_out):
    """Pure-JAX reference mirroring the PyTorch forward exactly."""
    d = x.shape[1]
    h = d // 2
    x1, x2 = x[:, :h], x[:, h:]
    for l in range(w_stack.shape[0]):
        w = w_stack[l]
        x1 = x1 + _leaky_relu(-(x2 @ w.T))
        x2 = x2 + _leaky_relu(x1 @ w)
    cat = jnp.concatenate([x1, x2], axis=1)
    return jax.nn.sigmoid(cat @ w_out.T)


if __name__ == "__main__":
    INPUT_SIZE = 32          # D; the two halves of size 16 feed the H x H coupling layers
    BATCH = 256

    key = jax.random.PRNGKey(0)
    k_x, k_p = jax.random.split(key)
    x = jax.random.normal(k_x, (BATCH, INPUT_SIZE), jnp.float32)
    w_stack, w_out = init_params(k_p, INPUT_SIZE)

    # Small batch_block so the demo exercises a multi-step grid (2 tiles of 128 rows).
    out = odrnn_forward(x, w_stack, w_out, batch_block=128)
    out = jax.block_until_ready(out)

    # Reference uses the same bf16-rounded activations the kernel streams from HBM.
    x_rounded = x.astype(jnp.bfloat16).astype(jnp.float32)
    ref = odrnn_forward_ref(x_rounded, w_stack, w_out)

    assert out.shape == (BATCH, 1)
    # Tolerance covers the approximate EUP reciprocal in the sigmoid epilogue.
    assert jnp.allclose(out, ref, atol=5e-3, rtol=5e-3), float(jnp.max(jnp.abs(out - ref)))

    print("KERNEL_OK")
</pallas_src>

<mosaic_0001>
module attributes {stable_mosaic.version = 11 : i64} {
  func.func @odrnn_kernel(%arg0: i32, %arg1: memref<32x128xbf16, #tpu.memory_space<vmem>>, %arg2: memref<4x16x16xf32, #tpu.memory_space<vmem>>, %arg3: memref<4x16x16xf32, #tpu.memory_space<vmem>>, %arg4: memref<32x1xf32, #tpu.memory_space<vmem>>, %arg5: memref<1x128xf32, #tpu.memory_space<vmem>>) attributes {dimension_semantics = [#tpu.dimension_semantics<parallel>], iteration_bounds = array<i64: 2>, scalar_prefetch = 0 : i64, scratch_operands = 0 : i64, tpu.core_type = #tpu.core_type<tc>, window_params = [{transform_indices = @transform_0, window_bounds = array<i64: 32, 128>}, {pipeline_mode = #tpu.pipeline_mode<synchronous>, transform_indices = @transform_1, window_bounds = array<i64: 4, 16, 16>}, {pipeline_mode = #tpu.pipeline_mode<synchronous>, transform_indices = @transform_2, window_bounds = array<i64: 4, 16, 16>}, {pipeline_mode = #tpu.pipeline_mode<synchronous>, transform_indices = @transform_3, window_bounds = array<i64: 32, 1>}, {transform_indices = @transform_4, window_bounds = array<i64: 1, 128>}]} {
    %c0 = arith.constant 0 : index
    %c0_0 = arith.constant 0 : index
    %0 = vector.load %arg1[%c0, %c0_0] : memref<32x128xbf16, #tpu.memory_space<vmem>>, vector<32x128xbf16>
    %1 = arith.extf %0 : vector<32x128xbf16> to vector<32x128xf32>
    %2 = vector.extract_strided_slice %1 {offsets = [0, 0], sizes = [16, 128], strides = [1, 1]} : vector<32x128xf32> to vector<16x128xf32>
    %3 = vector.extract_strided_slice %1 {offsets = [16, 0], sizes = [16, 128], strides = [1, 1]} : vector<32x128xf32> to vector<16x128xf32>
    %c0_1 = arith.constant 0 : index
    %c0_2 = arith.constant 0 : index
    %c0_3 = arith.constant 0 : index
    %4 = vector.load %arg2[%c0_1, %c0_2, %c0_3] : memref<4x16x16xf32, #tpu.memory_space<vmem>>, vector<1x16x16xf32>
    %5 = vector.shape_cast %4 : vector<1x16x16xf32> to vector<16x16xf32>
    %cst = arith.constant dense<0.000000e+00> : vector<16x128xf32>
    %6 = tpu.matmul %5, %3, %cst {dimension_numbers = #tpu.dot_dimension_numbers<[1], [0], [0], [1], [0, 0, 1, 1], [], []>} : vector<16x16xf32>, vector<16x128xf32>, vector<16x128xf32> -> vector<16x128xf32>
    %cst_4 = arith.constant 0.000000e+00 : f32
    %7 = vector.broadcast %cst_4 : f32 to vector<16x128xf32>
    %8 = arith.subf %7, %6 : vector<16x128xf32>
    %cst_5 = arith.constant 0.000000e+00 : f32
    %9 = vector.broadcast %cst_5 : f32 to vector<16x128xf32>
    %10 = arith.cmpf oge, %8, %9 : vector<16x128xf32>
    %cst_6 = arith.constant 0.00999999977 : f32
    %11 = vector.broadcast %cst_6 : f32 to vector<16x128xf32>
    %12 = arith.mulf %11, %8 : vector<16x128xf32>
    %13 = arith.select %10, %8, %12 : vector<16x128xi1>, vector<16x128xf32>
    %14 = arith.addf %2, %13 : vector<16x128xf32>
    %c0_7 = arith.constant 0 : index
    %c0_8 = arith.constant 0 : index
    %c0_9 = arith.constant 0 : index
    %15 = vector.load %arg3[%c0_7, %c0_8, %c0_9] : memref<4x16x16xf32, #tpu.memory_space<vmem>>, vector<1x16x16xf32>
    %16 = vector.shape_cast %15 : vector<1x16x16xf32> to vector<16x16xf32>
    %cst_10 = arith.constant dense<0.000000e+00> : vector<16x128xf32>
    %17 = tpu.matmul %16, %14, %cst_10 {dimension_numbers = #tpu.dot_dimension_numbers<[1], [0], [0], [1], [0, 0, 1, 1], [], []>} : vector<16x16xf32>, vector<16x128xf32>, vector<16x128xf32> -> vector<16x128xf32>
    %cst_11 = arith.constant 0.000000e+00 : f32
    %18 = vector.broadcast %cst_11 : f32 to vector<16x128xf32>
    %19 = arith.cmpf oge, %17, %18 : vector<16x128xf32>
    %cst_12 = arith.constant 0.00999999977 : f32
    %20 = vector.broadcast %cst_12 : f32 to vector<16x128xf32>
    %21 = arith.mulf %20, %17 : vector<16x128xf32>
    %22 = arith.select %19, %17, %21 : vector<16x128xi1>, vector<16x128xf32>
    %23 = arith.addf %3, %22 : vector<16x128xf32>
    %c1 = arith.constant 1 : index
    %c0_13 = arith.constant 0 : index
    %c0_14 = arith.constant 0 : index
    %24 = vector.load %arg2[%c1, %c0_13, %c0_14] : memref<4x16x16xf32, #tpu.memory_space<vmem>>, vector<1x16x16xf32>
    %25 = vector.shape_cast %24 : vector<1x16x16xf32> to vector<16x16xf32>
    %cst_15 = arith.constant dense<0.000000e+00> : vector<16x128xf32>
    %26 = tpu.matmul %25, %23, %cst_15 {dimension_numbers = #tpu.dot_dimension_numbers<[1], [0], [0], [1], [0, 0, 1, 1], [], []>} : vector<16x16xf32>, vector<16x128xf32>, vector<16x128xf32> -> vector<16x128xf32>
    %cst_16 = arith.constant 0.000000e+00 : f32
    %27 = vector.broadcast %cst_16 : f32 to vector<16x128xf32>
    %28 = arith.subf %27, %26 : vector<16x128xf32>
    %cst_17 = arith.constant 0.000000e+00 : f32
    %29 = vector.broadcast %cst_17 : f32 to vector<16x128xf32>
    %30 = arith.cmpf oge, %28, %29 : vector<16x128xf32>
    %cst_18 = arith.constant 0.00999999977 : f32
    %31 = vector.broadcast %cst_18 : f32 to vector<16x128xf32>
    %32 = arith.mulf %31, %28 : vector<16x128xf32>
    %33 = arith.select %30, %28, %32 : vector<16x128xi1>, vector<16x128xf32>
    %34 = arith.addf %14, %33 : vector<16x128xf32>
    %c1_19 = arith.constant 1 : index
    %c0_20 = arith.constant 0 : index
    %c0_21 = arith.constant 0 : index
    %35 = vector.load %arg3[%c1_19, %c0_20, %c0_21] : memref<4x16x16xf32, #tpu.memory_space<vmem>>, vector<1x16x16xf32>
    %36 = vector.shape_cast %35 : vector<1x16x16xf32> to vector<16x16xf32>
    %cst_22 = arith.constant dense<0.000000e+00> : vector<16x128xf32>
    %37 = tpu.matmul %36, %34, %cst_22 {dimension_numbers = #tpu.dot_dimension_numbers<[1], [0], [0], [1], [0, 0, 1, 1], [], []>} : vector<16x16xf32>, vector<16x128xf32>, vector<16x128xf32> -> vector<16x128xf32>
    %cst_23 = arith.constant 0.000000e+00 : f32
    %38 = vector.broadcast %cst_23 : f32 to vector<16x128xf32>
    %39 = arith.cmpf oge, %37, %38 : vector<16x128xf32>
    %cst_24 = arith.constant 0.00999999977 : f32
    %40 = vector.broadcast %cst_24 : f32 to vector<16x128xf32>
    %41 = arith.mulf %40, %37 : vector<16x128xf32>
    %42 = arith.select %39, %37, %41 : vector<16x128xi1>, vector<16x128xf32>
    %43 = arith.addf %23, %42 : vector<16x128xf32>
    %c2 = arith.constant 2 : index
    %c0_25 = arith.constant 0 : index
    %c0_26 = arith.constant 0 : index
    %44 = vector.load %arg2[%c2, %c0_25, %c0_26] : memref<4x16x16xf32, #tpu.memory_space<vmem>>, vector<1x16x16xf32>
    %45 = vector.shape_cast %44 : vector<1x16x16xf32> to vector<16x16xf32>
    %cst_27 = arith.constant dense<0.000000e+00> : vector<16x128xf32>
    %46 = tpu.matmul %45, %43, %cst_27 {dimension_numbers = #tpu.dot_dimension_numbers<[1], [0], [0], [1], [0, 0, 1, 1], [], []>} : vector<16x16xf32>, vector<16x128xf32>, vector<16x128xf32> -> vector<16x128xf32>
    %cst_28 = arith.constant 0.000000e+00 : f32
    %47 = vector.broadcast %cst_28 : f32 to vector<16x128xf32>
    %48 = arith.subf %47, %46 : vector<16x128xf32>
    %cst_29 = arith.constant 0.000000e+00 : f32
    %49 = vector.broadcast %cst_29 : f32 to vector<16x128xf32>
    %50 = arith.cmpf oge, %48, %49 : vector<16x128xf32>
    %cst_30 = arith.constant 0.00999999977 : f32
    %51 = vector.broadcast %cst_30 : f32 to vector<16x128xf32>
    %52 = arith.mulf %51, %48 : vector<16x128xf32>
    %53 = arith.select %50, %48, %52 : vector<16x128xi1>, vector<16x128xf32>
    %54 = arith.addf %34, %53 : vector<16x128xf32>
    %c2_31 = arith.constant 2 : index
    %c0_32 = arith.constant 0 : index
    %c0_33 = arith.constant 0 : index
    %55 = vector.load %arg3[%c2_31, %c0_32, %c0_33] : memref<4x16x16xf32, #tpu.memory_space<vmem>>, vector<1x16x16xf32>
    %56 = vector.shape_cast %55 : vector<1x16x16xf32> to vector<16x16xf32>
    %cst_34 = arith.constant dense<0.000000e+00> : vector<16x128xf32>
    %57 = tpu.matmul %56, %54, %cst_34 {dimension_numbers = #tpu.dot_dimension_numbers<[1], [0], [0], [1], [0, 0, 1, 1], [], []>} : vector<16x16xf32>, vector<16x128xf32>, vector<16x128xf32> -> vector<16x128xf32>
    %cst_35 = arith.constant 0.000000e+00 : f32
    %58 = vector.broadcast %cst_35 : f32 to vector<16x128xf32>
    %59 = arith.cmpf oge, %57, %58 : vector<16x128xf32>
    %cst_36 = arith.constant 0.00999999977 : f32
    %60 = vector.broadcast %cst_36 : f32 to vector<16x128xf32>
    %61 = arith.mulf %60, %57 : vector<16x128xf32>
    %62 = arith.select %59, %57, %61 : vector<16x128xi1>, vector<16x128xf32>
    %63 = arith.addf %43, %62 : vector<16x128xf32>
    %c3 = arith.constant 3 : index
    %c0_37 = arith.constant 0 : index
    %c0_38 = arith.constant 0 : index
    %64 = vector.load %arg2[%c3, %c0_37, %c0_38] : memref<4x16x16xf32, #tpu.memory_space<vmem>>, vector<1x16x16xf32>
    %65 = vector.shape_cast %64 : vector<1x16x16xf32> to vector<16x16xf32>
    %cst_39 = arith.constant dense<0.000000e+00> : vector<16x128xf32>
    %66 = tpu.matmul %65, %63, %cst_39 {dimension_numbers = #tpu.dot_dimension_numbers<[1], [0], [0], [1], [0, 0, 1, 1], [], []>} : vector<16x16xf32>, vector<16x128xf32>, vector<16x128xf32> -> vector<16x128xf32>
    %cst_40 = arith.constant 0.000000e+00 : f32
    %67 = vector.broadcast %cst_40 : f32 to vector<16x128xf32>
    %68 = arith.subf %67, %66 : vector<16x128xf32>
    %cst_41 = arith.constant 0.000000e+00 : f32
    %69 = vector.broadcast %cst_41 : f32 to vector<16x128xf32>
    %70 = arith.cmpf oge, %68, %69 : vector<16x128xf32>
    %cst_42 = arith.constant 0.00999999977 : f32
    %71 = vector.broadcast %cst_42 : f32 to vector<16x128xf32>
    %72 = arith.mulf %71, %68 : vector<16x128xf32>
    %73 = arith.select %70, %68, %72 : vector<16x128xi1>, vector<16x128xf32>
    %74 = arith.addf %54, %73 : vector<16x128xf32>
    %c3_43 = arith.constant 3 : index
    %c0_44 = arith.constant 0 : index
    %c0_45 = arith.constant 0 : index
    %75 = vector.load %arg3[%c3_43, %c0_44, %c0_45] : memref<4x16x16xf32, #tpu.memory_space<vmem>>, vector<1x16x16xf32>
    %76 = vector.shape_cast %75 : vector<1x16x16xf32> to vector<16x16xf32>
    %cst_46 = arith.constant dense<0.000000e+00> : vector<16x128xf32>
    %77 = tpu.matmul %76, %74, %cst_46 {dimension_numbers = #tpu.dot_dimension_numbers<[1], [0], [0], [1], [0, 0, 1, 1], [], []>} : vector<16x16xf32>, vector<16x128xf32>, vector<16x128xf32> -> vector<16x128xf32>
    %cst_47 = arith.constant 0.000000e+00 : f32
    %78 = vector.broadcast %cst_47 : f32 to vector<16x128xf32>
    %79 = arith.cmpf oge, %77, %78 : vector<16x128xf32>
    %cst_48 = arith.constant 0.00999999977 : f32
    %80 = vector.broadcast %cst_48 : f32 to vector<16x128xf32>
    %81 = arith.mulf %80, %77 : vector<16x128xf32>
    %82 = arith.select %79, %77, %81 : vector<16x128xi1>, vector<16x128xf32>
    %83 = arith.addf %63, %82 : vector<16x128xf32>
    %84 = tpu.concatenate %74, %83 in 0 : vector<16x128xf32>, vector<16x128xf32> -> vector<32x128xf32>
    %c0_49 = arith.constant 0 : index
    %c0_50 = arith.constant 0 : index
    %85 = vector.load %arg4[%c0_49, %c0_50] : memref<32x1xf32, #tpu.memory_space<vmem>>, vector<32x1xf32>
    %86 = vector.broadcast %85 : vector<32x1xf32> to vector<32x128xf32>
    %87 = arith.mulf %84, %86 : vector<32x128xf32>
    %cst_51 = arith.constant dense<0.000000e+00> : vector<128xf32>
    %88 = vector.multi_reduction <add>, %87, %cst_51 [0] : vector<32x128xf32> to vector<128xf32>
    %89 = vector.shape_cast %88 : vector<128xf32> to vector<1x128xf32>
    %cst_52 = arith.constant 0.000000e+00 : f32
    %90 = vector.broadcast %cst_52 : f32 to vector<1x128xf32>
    %91 = arith.subf %90, %89 : vector<1x128xf32>
    %92 = math.exp %91 : vector<1x128xf32>
    %cst_53 = arith.constant 1.000000e+00 : f32
    %93 = vector.broadcast %cst_53 : f32 to vector<1x128xf32>
    %94 = arith.addf %93, %92 : vector<1x128xf32>
    %95 = tpu.reciprocal %94 {approx = true} : vector<1x128xf32> -> vector<1x128xf32>
    %c0_54 = arith.constant 0 : index
    %c0_55 = arith.constant 0 : index
    %96 = vector.load %arg5[%c0_54, %c0_55] : memref<1x128xf32, #tpu.memory_space<vmem>>, vector<1x128xf32>
    tpu.vector_store %arg5[%c0_54, %c0_55], %95 {strides = array<i32>} : memref<1x128xf32, #tpu.memory_space<vmem>>, vector<1x128xf32>,
    return
  }
  func.func @transform_0(%arg0: i32) -> (i32, i32) {
    %c0_i32 = arith.constant 0 : i32
    %c0_i32_0 = arith.constant 0 : i32
    return %c0_i32, %arg0 : i32, i32
  }
  func.func @transform_1(%arg0: i32) -> (i32, i32, i32) {
    %c0_i32 = arith.constant 0 : i32
    %c0_i32_0 = arith.constant 0 : i32
    %c0_i32_1 = arith.constant 0 : i32
    %c0_i32_2 = arith.constant 0 : i32
    return %c0_i32, %c0_i32_0, %c0_i32_1 : i32, i32, i32
  }
  func.func @transform_2(%arg0: i32) -> (i32, i32, i32) {
    %c0_i32 = arith.constant 0 : i32
    %c0_i32_0 = arith.constant 0 : i32
    %c0_i32_1 = arith.constant 0 : i32
    %c0_i32_2 = arith.constant 0 : i32
    return %c0_i32, %c0_i32_0, %c0_i32_1 : i32, i32, i32
  }
  func.func @transform_3(%arg0: i32) -> (i32, i32) {
    %c0_i32 = arith.constant 0 : i32
    %c0_i32_0 = arith.constant 0 : i32
    %c0_i32_1 = arith.constant 0 : i32
    return %c0_i32, %c0_i32_0 : i32, i32
  }
  func.func @transform_4(%arg0: i32) -> (i32, i32) {
    %c0_i32 = arith.constant 0 : i32
    %c0_i32_0 = arith.constant 0 : i32
    return %c0_i32, %arg0 : i32, i32
  }
}

</mosaic_0001>

<bundles_post_ra>
// kernel: tpu_custom_call.1
= control target key start
LH: loop header
LB: loop body
LE: loop exit
PB: predicated region body
PF: predicated region fallthrough
CT: control target
= control target key end

     0   :  { %9 = vsyncpa [#allocation4], 0  ;;  %s1697_s0 = inlined_call_operand.vmem [shape: bf16[32,256], index: 0, kind: input, shape index: {}]   ;;  %s1698_s1 = inlined_call_operand.hbm [shape: f32[4,16,16], index: 1, kind: input, shape index: {}]   ;;  %s1699_s2 = inlined_call_operand.hbm [shape: f32[4,16,16], index: 2, kind: input, shape index: {}]   ;;  %s1700_s3 = inlined_call_operand.vmem [shape: f32[32,1], index: 3, kind: input, shape index: {}]   ;;  %s1701_s4 = inlined_call_operand.hbm [shape: f32[1,256], index: 4, kind: output, shape index: {}]  }
   0x1   :  { %10 = vsyncpa [#allocation7], 0 }
   0x2   :  { %11 = vsyncpa [#allocation5], 0 }
   0x3   :  { %13 = vsyncpa [#allocation5 + $0x1], 0  ;;  %s1519_s15 = smov 0   ;;  %s1521_s16 = smov 0  }
   0x4   :  { %s1523_s17 = smov 0   ;;  %s1525_s18 = smov 0  }
   0x5 LB: > { %s1540_s19 = sadd.s32 4294967295, %s1486_s18   ;;  %s1170_s20 = sadd.s32 4294967294, %s1486_s18   ;;  %s1486_s18 = sphi %s1525_s18, %s1718_s18   ;;  %s1482_s17 = sphi %s1523_s17, %s1717_s17   ;;  %s1478_s16 = sphi %s1521_s16, %s1716_s16   ;;  %s1474_s15 = sphi %s1519_s15, %s1715_s15  }
   0x6   : > { %s1544_s21 = sadd.s32 1, %s1486_s18   ;;  %s26_s22 = sadd.s32 1, %s1482_s17 }
   0x7   : > { %s23_s23 = ssub.s32 %s1486_s18, %s1544_s21  ;;  %p33_p0 = scmp.ne.s32.totalorder %s1482_s17, %s1478_s16 }
   0x8   : > { %p24_p1 = scmp.eq.s32.totalorder %s23_s23, 0  ;;  %p34_p2 = scmp.eq.s32.totalorder %s1486_s18, 0 }
   0x9   : > { %p126_p3 = scmp.eq.s32.totalorder %s1540_s19, 1  ;;  %p131_p4 = scmp.ne.s32.totalorder %s1478_s16, %s1474_s15 }
   0xa   : > { %s1556_s24 = scalar_select %p24_p1, %s1482_s17, %s26_s22  }
   0xb   : > { %p1558_p5 = por %p34_p2, %p33_p0  ;;  %p1562_p6 = por %p126_p3, %p33_p0 }
   0xc   : > { %p132_p7 = scmp.eq.s32.totalorder %s1170_s20, 1  ;;  %p1171_p8 = scmp.ge.s32.totalorder %s1486_s18, 1 }
   0xd   : > { %s1705_s26 = scalar_select %p1562_p6, 1, 0 }
   0xe   : > { %p139_p9 = scmp.lt.s32.totalorder %s1486_s18, 3  ;;  %p1568_p10 = por %p132_p7, %p131_p4 }
   0xf   : > { %p1702_p11 = scmp.eq.s32.totalorder %s1540_s19, 0  ;;  %s1488_s29 = smov [#allocation3]  }
  0x10   : > { %s1706_s27 = scalar_select %p1568_p10, 1, 0 }
  0x11   : > { %p1573_p12 = pnand %p1171_p8, %p139_p9  ;;  %s151_s30 = sshll.u32 %s1488_s29, 4  ;;  %s152_s30 = int_to_ptr.vmem [resolvable:$true] %s151_s30 }
  0x12   : > { %s1489_s6 = smov [#allocation6]   ;;  %s1377_s8 = scalar_lea.vmem %s152_s30, 1024 }
  0x13   : > { %p1307_p13 = pneg %p1573_p12  ;;  %s164_s7 = sshll.u32 %s1489_s6, 4  ;;  %s165_s7 = int_to_ptr.vmem [resolvable:$true] %s164_s7 }
  0x14   : > { %p1378_p2 = scmp.ne.s32.totalorder %s152_s30, %s1377_s8  ;;  %p1385_p7 = scmp.lt.s32.totalorder %s152_s30, %s152_s30 }
  0x15   : > { %p1581_p0 = pnand %p1702_p11, %p1307_p13  ;;  %p1386_p8 = scmp.lt.s32.totalorder %s1377_s8, %s1377_s8 }
  0x17   : > { %p1368_p1 = pneg %p1581_p0  ;;  %p1387_p9 = por %p1386_p8, %p1385_p7 }
  0x19   : > { %p1380_p3 = pnand %p1378_p2, %p1368_p1 }
  0x1b   : > { %p1381_p4 = pneg %p1380_p3 }
  0x1d   : > { %p1388_p13 = pnand %p1387_p9, %p1381_p4 }
  0x1f   : > { %1391 = shalt.err (!%p1388_p13)
}
  0x20   : > { %s1490_s9 = smov 128   ;;  %s1491_s10 = smov 8  }
  0x21   : > { %1310 = dma.hbm_to_vmem [thread:$0]  (!%p1581_p0), %s1698_s1, 1024, %s152_s30, [#allocation4], %s1490_s9, %s1490_s9, %s1491_s10  }
  0x22   : > { %s1403_s13 = scalar_lea.vmem %s165_s7, 1024  ;;  %p1411_p10 = scmp.lt.s32.totalorder %s165_s7, %s165_s7 }
  0x23   : > { %p1404_p11 = scmp.ne.s32.totalorder %s165_s7, %s1403_s13  ;;  %p1412_p6 = scmp.lt.s32.totalorder %s1403_s13, %s1403_s13 }
  0x25   : > { %p1406_p2 = pnand %p1404_p11, %p1368_p1  ;;  %p1413_p7 = por %p1412_p6, %p1411_p10 }
  0x27   : > { %p1407_p3 = pneg %p1406_p2 }
  0x29   : > { %p1414_p4 = pnand %p1413_p7, %p1407_p3 }
  0x2b   : > { %1417 = shalt.err (!%p1414_p4)
}
  0x2c   : > { %1313 = dma.hbm_to_vmem [thread:$0]  (!%p1581_p0), %s1699_s2, 1024, %s165_s7, [#allocation7], %s1490_s9, %s1490_s9, %s1491_s10  }
  0x2d   : > { %p1174_p8 = scmp.ge.s32.totalorder %s1486_s18, 2 }
  0x2f   : > { %177 = sbr.rel (%p1174_p8) target bundleno = 58 (0x3a), region = 28 }
  0x34   : > { %180 = sbr.rel (!%p1558_p5) target bundleno = 58 (0x3a), region = 32  ;;  %s182_s22 = sand.u32 (%p1558_p5), 1, %s1482_s17  }
  0x35   : > { %s1176_s23 = sshll.u32 (%p1558_p5), %s1486_s18, 2  ;;  %s1175_s29 = sshll.u32 (%p1558_p5), %s182_s22, 4 }
  0x36   : > { %s186_s5 = scalar_lea.vmem (%p1558_p5), %s1697_s0, %s1176_s23  ;;  %s184_s7 = scalar_lea.vmem (%p1558_p5), [#allocation2], %s1175_s29 }
  0x37   : > { %v203_v0 = vld [vmem:[%s186_s5] sm:$0xf] (%p1558_p5)  ;;  %v205_v1 = vld [vmem:[%s186_s5 + $0x8] sm:$0xf] (%p1558_p5)  ;;  %v207_v2 = vld [vmem:[%s186_s5 + $0x10] sm:$0xf] (%p1558_p5) }
  0x38   : > { %204 = vst [vmem:[%s184_s7] sm:$0xf] (%p1558_p5), %v203_v0  ;;  %206 = vst [vmem:[%s184_s7 + $0x4] sm:$0xf] (%p1558_p5), %v205_v1  ;;  %v209_v3 = vld [vmem:[%s186_s5 + $0x18] sm:$0xf] (%p1558_p5) }
  0x39   : > { %208 = vst [vmem:[%s184_s7 + $0x8] sm:$0xf] %v207_v2  ;;  %210 = vst [vmem:[%s184_s7 + $0xc] sm:$0xf] %v209_v3 }
  0x3a PF: > { %245 = sbr.rel (%p1573_p12) target bundleno = 1761 (0x6e1), region = 73  ;;  %s1616_s25 = sand.u32 (!%p1573_p12), 1, %s1478_s16  }
  0x3b   : > { %s1178_s8 = sshll.u32 (!%p1573_p12), %s1616_s25, 4  ;;  %p1709_p5 = scmp.eq.s32.totalorder (!%p1573_p12), %s1540_s19, 0 }
  0x3c   : > { %s250_s9 = scalar_lea.vmem (!%p1573_p12), [#allocation2], %s1178_s8 }
  0x3f   : > { %1461 = dma.done.wait (%p1709_p5), [#allocation4], 1024   ;;  %p1710_p6 = pmov %p1709_p5 }
  0x40   : > { %p1711_p10 = pmov %p1709_p5 }
  0x41   : > { %1463 = vsyncadd (%p1710_p6), [#allocation4], 4294966272 }
  0x42   : > { %1465 = dma.done.wait (%p1711_p10), [#allocation7], 1024   ;;  %p1712_p11 = pmov %p1709_p5 }
  0x43   : > { %vm290_vm0 = vcmask 130048   ;;  %v1208_v4 = vld [vmem:[%s250_s9 + $0x8] sm:$0xff]   ;;  %v288_v5 = vld [vmem:[#allocation3] sm:$0xff]  ;;  %v474_v24 = vld [vmem:[#allocation3 + $0x10] sm:$0xff]  ;;  %s1197_s23 = sshll.u32 %s1540_s19, 4  ;;  %s279_s29 = scalar_lea.vmem [#allocation8], %s1616_s25 }
  0x44   : > { %1467 = vsyncadd (%p1712_p11), [#allocation7], 4294966272  ;;  %v1207_v6 = vunpack.c.h.bf16 %v1208_v4  ;;  %v1206_v7 = vunpack.c.l.bf16 %v1208_v4  ;;  %1245 = vmatprep.mubr.msk.f32.mxu0 %vm290_vm0, %v288_v5  ;;  %v289_v8 = vld [vmem:[#allocation3 + $0x8] sm:$0xff]  ;;  %v382_v9 = vld [vmem:[#allocation6] sm:$0xff]  ;;  %s1087_s30 = sshll.u32 %s279_s29, 4  ;;  %s1660_s7 = scalar_lea.hbm %s1701_s4, %s1197_s23  ;;  %s1088_s30 = int_to_ptr.vmem [resolvable:$true] %s1087_s30 }
  0x45   : > { %1252 = vmatprep.mubr.msk.f32.mxu1 %vm290_vm0, %v382_v9  ;;  %v1201_v10 = vld [vmem:[%s250_s9] sm:$0xff]   ;;  %v383_v23 = vld [vmem:[#allocation6 + $0x8] sm:$0xff]  ;;  %v475_v33 = vld [vmem:[#allocation3 + $0x18] sm:$0xff]  ;;  %s1075_s8 = scalar_lea.sflag [#allocation5], %s1616_s25  ;;  %s1418_s9 = scalar_lea.vmem %s1088_s30, 16 }
  0x46   : > { %1241 = vmatprep.subr.mxu0 %v1207_v6  ;;  %v1203_v14 = vunpack.c.h.bf16 %v1201_v10  ;;  %v1202_v17 = vunpack.c.l.bf16 %v1201_v10  ;;  %v568_v34 = vld [vmem:[#allocation6 + $0x10] sm:$0xff]  ;;  %v569_v45 = vld [vmem:[#allocation6 + $0x18] sm:$0xff]  ;;  %v660_v46 = vld [vmem:[#allocation3 + $0x20] sm:$0xff]  ;;  %p1419_p12 = scmp.ne.s32.totalorder %s1088_s30, %s1418_s9  ;;  %p1713_p0 = scmp.ne.s32.totalorder %s1705_s26, 0 }
  0x47   : > { %1242 = vmatpush3.msra.mxu0 %v1207_v6  ;;  %v661_v55 = vld [vmem:[#allocation3 + $0x28] sm:$0xff]  ;;  %v754_v56 = vld [vmem:[#allocation6 + $0x20] sm:$0xff]  ;;  %v846_v4 = vld [vmem:[#allocation3 + $0x30] sm:$0xff]  ;;  %s1493_s28 = smov [#allocation8]  }
  0x48   : > { %1243 = vmatprep.subr.mxu0 %v1206_v7  ;;  %v755_v3 = vld [vmem:[#allocation6 + $0x28] sm:$0xff]  ;;  %v1031_v5 = vld [vmem:[%s1700_s3] sm:$0xff]  ;;  %p1420_p1 = pnand %p1419_p12, %p1713_p0  ;;  %s1422_s10 = sshll.u32 %s1493_s28, 4  ;;  %s1423_s10 = int_to_ptr.vmem [resolvable:$false] %s1422_s10 }
  0x49   : > { %1244 = vmatpush3.msra.mxu0 %v1206_v7  ;;  %s1424_s19 = scalar_lea.vmem %s1423_s10, 32  ;;  %p1425_p13 = scmp.lt.s32.totalorder %s1088_s30, %s1423_s10 }
  0x4a   : > { %1246 = vmatmul.mubr.msk.f32.vlgmr.msra.gmra.mxu0 %vm290_vm0, %v289_v8  ;;  %p1421_p9 = pneg %p1420_p1  ;;  %p1426_p2 = scmp.lt.s32.totalorder %s1424_s19, %s1418_s9 }
  0x4b   : > { %1259 = vmatprep.mubr.msk.f32.mxu0 %vm290_vm0, %v474_v24 }
  0x4c   : > { %p1427_p3 = por %p1426_p2, %p1425_p13 }
  0x4e   : > { %p1428_p7 = pnand %p1427_p3, %p1421_p9 }
 0x10a   : > { %v1247_v11 = vpop.f32.mrf.mxu0 }
 0x10b   : > { %v373_v12 = vsub.f32 0.0, %v1247_v11 }
 0x10c   : > { %v363_v13 = vpop.f32.mrf.mxu0 }
 0x10d   : > { %vm375_vm1 = vcmp.ge.f32.partialorder %v373_v12, 0.0  ;;  %v377_v15 = vmul.f32 0.01, %v373_v12  ;;  %v372_v16 = vsub.f32 0.0, %v363_v13 }
 0x10f   : > { %vm374_vm2 = vcmp.ge.f32.partialorder %v372_v16, 0.0  ;;  %v376_v18 = vmul.f32 0.01, %v372_v16  ;;  %v379_v19 = vsel %vm375_vm1, %v373_v12, %v377_v15 }
 0x110   : > { %v381_v20 = vadd.f32 %v1203_v14, %v379_v19  ;;  %v1034_v19 = vld [vmem:[%s1700_s3 + $0x18] sm:$0xff] }
 0x111   : > { %v378_v21 = vsel %vm374_vm2, %v372_v16, %v376_v18  ;;  %v847_v16 = vld [vmem:[#allocation3 + $0x38] sm:$0xff]  ;;  %v1033_v18 = vld [vmem:[%s1700_s3 + $0x10] sm:$0xff] }
 0x112   : > { %1248 = vmatprep.subr.mxu1 %v381_v20  ;;  %v380_v22 = vadd.f32 %v1202_v17, %v378_v21  ;;  %v940_v17 = vld [vmem:[#allocation6 + $0x30] sm:$0xff] }
 0x113   : > { %1249 = vmatpush3.msra.mxu1 %v381_v20 }
 0x114   : > { %1250 = vmatprep.subr.mxu1 %v380_v22 }
 0x115   : > { %1251 = vmatpush3.msra.mxu1 %v380_v22 }
 0x116   : > { %1253 = vmatmul.mubr.msk.f32.vlgmr.msra.gmra.mxu1 %vm290_vm0, %v383_v23 }
 0x117   : > { %1266 = vmatprep.mubr.msk.f32.mxu1 %vm290_vm0, %v568_v34 }
 0x1d6   : > { %v1254_v25 = vpop.f32.mrf.mxu1 }
 0x1d7   : > { %vm466_vm3 = vcmp.ge.f32.partialorder %v1254_v25, 0.0  ;;  %v468_v26 = vmul.f32 0.01, %v1254_v25 }
 0x1d8   : > { %v456_v27 = vpop.f32.mrf.mxu1 }
 0x1d9   : > { %v470_v28 = vsel %vm466_vm3, %v1254_v25, %v468_v26  ;;  %vm465_vm4 = vcmp.ge.f32.partialorder %v456_v27, 0.0  ;;  %v467_v29 = vmul.f32 0.01, %v456_v27 }
 0x1da   : > { %v472_v30 = vadd.f32 %v1207_v6, %v470_v28  ;;  %v1492_v6 = vmov 0  }
 0x1db   : > { %v469_v31 = vsel %vm465_vm4, %v456_v27, %v467_v29  ;;  %1360 = vset.pattern.permute.xlu0 %v1492_v6  ;;  %1361 = vset.pattern.permute.xlu1 %v1492_v6 }
 0x1dc   : > { %1255 = vmatprep.subr.mxu0 %v472_v30  ;;  %v471_v32 = vadd.f32 %v1206_v7, %v469_v31  ;;  %1037 = vperm.xlu0 %1360, %v1031_v5   ;;  %v1032_v7 = vld [vmem:[%s1700_s3 + $0x8] sm:$0xff] }
 0x1dd   : > { %1256 = vmatpush3.msra.mxu0 %v472_v30  ;;  %1047 = vperm.xlu1 %1361, %v1033_v18  }
 0x1de   : > { %1257 = vmatprep.subr.mxu0 %v471_v32 }
 0x1df   : > { %1258 = vmatpush3.msra.mxu0 %v471_v32 }
 0x1e0   : > { %1260 = vmatmul.mubr.msk.f32.vlgmr.msra.gmra.mxu0 %vm290_vm0, %v475_v33  ;;  %1042 = vperm.xlu0 %1360, %v1032_v7  }
 0x1e1   : > { %1273 = vmatprep.mubr.msk.f32.mxu0 %vm290_vm0, %v660_v46  ;;  %1052 = vperm.xlu1 %1361, %v1034_v19  }
 0x2a0   : > { %v1261_v35 = vpop.f32.mrf.mxu0 }
 0x2a1   : > { %v558_v36 = vsub.f32 0.0, %v1261_v35 }
 0x2a2   : > { %v548_v37 = vpop.f32.mrf.mxu0 }
 0x2a3   : > { %vm560_vm5 = vcmp.ge.f32.partialorder %v558_v36, 0.0  ;;  %v562_v38 = vmul.f32 0.01, %v558_v36  ;;  %v557_v39 = vsub.f32 0.0, %v548_v37 }
 0x2a5   : > { %vm559_vm6 = vcmp.ge.f32.partialorder %v557_v39, 0.0  ;;  %v561_v40 = vmul.f32 0.01, %v557_v39  ;;  %v564_v41 = vsel %vm560_vm5, %v558_v36, %v562_v38  ;;  %v1048_v38 = vpop.permute.xlu1 %1047 }
 0x2a6   : > { %v566_v42 = vadd.f32 %v564_v41, %v381_v20 }
 0x2a7   : > { %v563_v43 = vsel %vm559_vm6, %v557_v39, %v561_v40 }
 0x2a8   : > { %1262 = vmatprep.subr.mxu1 %v566_v42  ;;  %v565_v44 = vadd.f32 %v563_v43, %v380_v22  ;;  %v1038_v22 = vpop.permute.xlu0 %1037 }
 0x2a9   : > { %1263 = vmatpush3.msra.mxu1 %v566_v42 }
 0x2aa   : > { %1264 = vmatprep.subr.mxu1 %v565_v44 }
 0x2ab   : > { %1265 = vmatpush3.msra.mxu1 %v565_v44 }
 0x2ac   : > { %1267 = vmatmul.mubr.msk.f32.vlgmr.msra.gmra.mxu1 %vm290_vm0, %v569_v45  ;;  %v1053_v45 = vpop.permute.xlu1 %1052 }
 0x2ad   : > { %1280 = vmatprep.mubr.msk.f32.mxu1 %vm290_vm0, %v754_v56 }
 0x36c   : > { %v1268_v47 = vpop.f32.mrf.mxu1 }
 0x36d   : > { %vm652_vm7 = vcmp.ge.f32.partialorder %v1268_v47, 0.0  ;;  %v654_v48 = vmul.f32 0.01, %v1268_v47 }
 0x36e   : > { %v642_v49 = vpop.f32.mrf.mxu1 }
 0x36f   : > { %v656_v50 = vsel %vm652_vm7, %v1268_v47, %v654_v48  ;;  %vm651_vm8 = vcmp.ge.f32.partialorder %v642_v49, 0.0  ;;  %v653_v51 = vmul.f32 0.01, %v642_v49 }
 0x370   : > { %v658_v52 = vadd.f32 %v656_v50, %v472_v30  ;;  %v1043_v30 = vpop.permute.xlu0 %1042 }
 0x371   : > { %v655_v53 = vsel %vm651_vm8, %v642_v49, %v653_v51 }
 0x372   : > { %1269 = vmatprep.subr.mxu0 %v658_v52  ;;  %v657_v54 = vadd.f32 %v655_v53, %v471_v32  ;;  %v941_v32 = vld [vmem:[#allocation6 + $0x38] sm:$0xff] }
 0x373   : > { %1270 = vmatpush3.msra.mxu0 %v658_v52 }
 0x374   : > { %1271 = vmatprep.subr.mxu0 %v657_v54 }
 0x375   : > { %1272 = vmatpush3.msra.mxu0 %v657_v54 }
 0x376   : > { %1274 = vmatmul.mubr.msk.f32.vlgmr.msra.gmra.mxu0 %vm290_vm0, %v661_v55 }
 0x377   : > { %1287 = vmatprep.mubr.msk.f32.mxu0 %vm290_vm0, %v846_v4 }
 0x436   : > { %v1275_v57 = vpop.f32.mrf.mxu0 }
 0x437   : > { %v744_v58 = vsub.f32 0.0, %v1275_v57 }
 0x438   : > { %v734_v59 = vpop.f32.mrf.mxu0 }
 0x439   : > { %vm746_vm9 = vcmp.ge.f32.partialorder %v744_v58, 0.0  ;;  %v748_v60 = vmul.f32 0.01, %v744_v58  ;;  %v743_v61 = vsub.f32 0.0, %v734_v59 }
 0x43b   : > { %vm745_vm10 = vcmp.ge.f32.partialorder %v743_v61, 0.0  ;;  %v747_v62 = vmul.f32 0.01, %v743_v61  ;;  %v750_v63 = vsel %vm746_vm9, %v744_v58, %v748_v60 }
 0x43c   : > { %v752_v0 = vadd.f32 %v750_v63, %v566_v42 }
 0x43d   : > { %v749_v1 = vsel %vm745_vm10, %v743_v61, %v747_v62 }
 0x43e   : > { %1276 = vmatprep.subr.mxu1 %v752_v0  ;;  %v751_v2 = vadd.f32 %v749_v1, %v565_v44 }
 0x43f   : > { %1277 = vmatpush3.msra.mxu1 %v752_v0 }
 0x440   : > { %1278 = vmatprep.subr.mxu1 %v751_v2 }
 0x441   : > { %1279 = vmatpush3.msra.mxu1 %v751_v2 }
 0x442   : > { %1281 = vmatmul.mubr.msk.f32.vlgmr.msra.gmra.mxu1 %vm290_vm0, %v755_v3 }
 0x443   : > { %1294 = vmatprep.mubr.msk.f32.mxu1 %vm290_vm0, %v940_v17 }
 0x502   : > { %v1282_v8 = vpop.f32.mrf.mxu1 }
 0x503   : > { %vm838_vm11 = vcmp.ge.f32.partialorder %v1282_v8, 0.0  ;;  %v840_v9 = vmul.f32 0.01, %v1282_v8 }
 0x504   : > { %v828_v10 = vpop.f32.mrf.mxu1 }
 0x505   : > { %v842_v11 = vsel %vm838_vm11, %v1282_v8, %v840_v9  ;;  %vm837_vm12 = vcmp.ge.f32.partialorder %v828_v10, 0.0  ;;  %v839_v12 = vmul.f32 0.01, %v828_v10 }
 0x506   : > { %v844_v13 = vadd.f32 %v842_v11, %v658_v52 }
 0x507   : > { %v841_v14 = vsel %vm837_vm12, %v828_v10, %v839_v12 }
 0x508   : > { %1283 = vmatprep.subr.mxu0 %v844_v13  ;;  %v843_v15 = vadd.f32 %v841_v14, %v657_v54 }
 0x509   : > { %1284 = vmatpush3.msra.mxu0 %v844_v13 }
 0x50a   : > { %1285 = vmatprep.subr.mxu0 %v843_v15 }
 0x50b   : > { %1286 = vmatpush3.msra.mxu0 %v843_v15 }
 0x50c   : > { %1288 = vmatmul.mubr.msk.f32.vlgmr.msra.gmra.mxu0 %vm290_vm0, %v847_v16 }
 0x5cc   : > { %v1289_v20 = vpop.f32.mrf.mxu0 }
 0x5cd   : > { %v930_v21 = vsub.f32 0.0, %v1289_v20 }
 0x5ce   : > { %v920_v23 = vpop.f32.mrf.mxu0 }
 0x5cf   : > { %vm932_vm13 = vcmp.ge.f32.partialorder %v930_v21, 0.0  ;;  %v934_v24 = vmul.f32 0.01, %v930_v21  ;;  %v929_v25 = vsub.f32 0.0, %v920_v23 }
 0x5d1   : > { %v936_v26 = vsel %vm932_vm13, %v930_v21, %v934_v24  ;;  %vm931_vm14 = vcmp.ge.f32.partialorder %v929_v25, 0.0  ;;  %v933_v27 = vmul.f32 0.01, %v929_v25 }
 0x5d2   : > { %v938_v28 = vadd.f32 %v936_v26, %v752_v0 }
 0x5d3   : > { %v935_v29 = vsel %vm931_vm14, %v929_v25, %v933_v27 }
 0x5d4   : > { %v937_v31 = vadd.f32 %v935_v29, %v751_v2  ;;  %1290 = vmatprep.subr.mxu1 %v938_v28  ;;  %v1056_v34 = vmul.f32 %v1043_v30, %v938_v28 }
 0x5d5   : > { %1291 = vmatpush3.msra.mxu1 %v938_v28 }
 0x5d6   : > { %v1055_v33 = vmul.f32 %v1038_v22, %v937_v31  ;;  %1292 = vmatprep.subr.mxu1 %v937_v31 }
 0x5d7   : > { %1293 = vmatpush3.msra.mxu1 %v937_v31 }
 0x5d8   : > { %v1059_v35 = vadd.f32 %v1056_v34, %v1055_v33  ;;  %1295 = vmatmul.mubr.msk.f32.vlgmr.msra.gmra.mxu1 %vm290_vm0, %v941_v32 }
 0x698   : > { %v1296_v36 = vpop.f32.mrf.mxu1 }
 0x699   : > { %vm1024_vm15 = vcmp.ge.f32.partialorder %v1296_v36, 0.0  ;;  %v1026_v37 = vmul.f32 0.01, %v1296_v36 }
 0x69a   : > { %v1014_v39 = vpop.f32.mrf.mxu1 }
 0x69b   : > { %vm1023_vm1 = vcmp.ge.f32.partialorder %v1014_v39, 0.0  ;;  %v1025_v40 = vmul.f32 0.01, %v1014_v39  ;;  %v1028_v41 = vsel %vm1024_vm15, %v1296_v36, %v1026_v37 }
 0x69c   : > { %v1030_v44 = vadd.f32 %v1028_v41, %v844_v13 }
 0x69d   : > { %v1027_v42 = vsel %vm1023_vm1, %v1014_v39, %v1025_v40 }
 0x69e   : > { %v1029_v43 = vadd.f32 %v1027_v42, %v843_v15  ;;  %v1058_v47 = vmul.f32 %v1053_v45, %v1030_v44 }
 0x6a0   : > { %v1057_v46 = vmul.f32 %v1048_v38, %v1029_v43 }
 0x6a2   : > { %v1060_v48 = vadd.f32 %v1059_v35, %v1057_v46 }
 0x6a4   : > { %v1061_v49 = vadd.f32 %v1060_v48, %v1058_v47 }
 0x6a6   : > { %v1062_v50 = vrot.slane %v1061_v49, 4 }
 0x6a8   : > { %v1063_v51 = vadd.f32 %v1062_v50, %v1061_v49 }
 0x6aa   : > { %v1064_v52 = vrot.slane %v1063_v51, 2 }
 0x6ac   : > { %v1065_v53 = vadd.f32 %v1064_v52, %v1063_v51 }
 0x6ae   : > { %v1066_v54 = vrot.slane %v1065_v53, 1 }
 0x6b0   : > { %v1067_v55 = vadd.f32 %v1066_v54, %v1065_v53 }
 0x6b2   : > { %v1068_v56 = vsub.f32 0.0, %v1067_v55 }
 0x6b4   : > { %v1069_v57 = vmul.f32 1.442695, %v1068_v56 }
 0x6b6   : > { %1362 = vpow2.f32 %v1069_v57 }
 0x6c3   : > { %v1363_v58 = vpop.eup %1362 }
 0x6c4   : > { %v1071_v59 = vadd.f32 1.0, %v1363_v58 }
 0x6c6   : > { %1364 = vrcp.f32 %v1071_v59 }
 0x6d3   : > { %v1365_v60 = vpop.eup %1364 }
 0x6d4   : > { %1073 = vst [vmem:[%s279_s29] sm:$0x1] %v1365_v60 }
 0x6d5   : > { %1431 = shalt.err (!%p1428_p7)
}
 0x6d6   : > { %s1432_s11 = scalar_lea.hbm %s1660_s7, 16  ;;  %s1436_s13 = scalar_lea.hbm %s1701_s4, 32 }
 0x6d7   : > { %p1433_p4 = scmp.ne.s32.totalorder %s1660_s7, %s1432_s11  ;;  %p1437_p10 = scmp.lt.s32.totalorder %s1660_s7, %s1701_s4 }
 0x6d8   : > { %p1438_p11 = scmp.lt.s32.totalorder %s1436_s13, %s1432_s11 }
 0x6d9   : > { %p1434_p5 = pnand %p1433_p4, %p1713_p0 }
 0x6da   : > { %p1439_p12 = por %p1438_p11, %p1437_p10 }
 0x6db   : > { %p1435_p6 = pneg %p1434_p5 }
 0x6dd   : > { %p1440_p1 = pnand %p1439_p12, %p1435_p6 }
 0x6df   : > { %1443 = shalt.err (!%p1440_p1)
}
 0x6e0   : > { %1305 = dma.vmem_to_hbm [thread:$0]  (%p1713_p0), %s1088_s30, 16, %s1660_s7, %s1075_s8  }
 0x6e1 PF: > { %s1099_s22 = sand.u32 1, %s1474_s15   ;;  %p1714_p9 = scmp.ne.s32.totalorder %s1706_s27, 0 }
 0x6e2   : > { %s1100_s23 = scalar_lea.sflag [#allocation5], %s1099_s22 }
 0x6e3   : > { %p1315_p13 = pnand %p1174_p8, %p1714_p9 }
 0x6e5   : > { %p1316_p2 = pneg %p1315_p13 }
 0x6e7   : > { %1469 = dma.done.wait (%p1316_p2), %s1100_s23, 16  }
 0x6e8   : > { %1471 = vsyncadd (%p1316_p2), %s1100_s23, 4294967280  ;;  %p16_p3 = scmp.ge.s32.totalorder %s1544_s21, 4   ;;  %s1715_s15 = smov %s1478_s16 }
 0x6e9   : > { %s1716_s16 = smov %s1482_s17  ;;  %s1717_s17 = smov %s1556_s24 }
 0x6ea   : > { %s1718_s18 = smov %s1544_s21  ;;  %18 = sbr.rel (!%p16_p3) target bundleno = 5 (0x5), region = 132 }
 0x6ef   :  { %1104 = vsyncpa [#allocation4], 1 }
 0x6f0   :  { %1106 = vsyncpa [#allocation4 + $0x1], 1 }
 0x6f1   :  { %1107 = vsyncpa [#allocation7], 1 }
 0x6f2   :  { %1108 = vsyncpa [#allocation5], 1 }
 0x6f3   :  { %1110 = vsyncpa [#allocation5 + $0x1], 1 }

</bundles_post_ra>
